<compile_context>
chip_gen: v6e
topology: v6e:2x2x1
jax: 0.10.0
libtpu: 0.0.40
codegen_flags: <defaults>
</compile_context>

<pallas_src>
import functools
import math

import jax
import jax.numpy as jnp
from jax.experimental import pallas as pl
from jax.experimental.pallas import tpu as pltpu

_LANE = 128


def _round_up(x, m):
    return ((x + m - 1) // m) * m


def _gelu(h, approximate):
    if approximate:
        # tanh form: goes through the EUP slot (co-issues with loads/stores/matmul).
        return jax.nn.gelu(h, approximate=True)
    # exact erf form: matches torch.nn.GELU() default numerics.
    return 0.5 * h * (1.0 + jax.lax.erf(h * (1.0 / math.sqrt(2.0))))


def _mlp_kernel_scalar_t(t_sref, z_ref, w1t_ref, w1z_ref, b1_ref, w2_ref, b2_ref,
                         o_ref, *, approximate_gelu):
    """Scalar-t path: t lives in SMEM (scalar prefetch); fold it into the bias row."""
    t = t_sref[0]                                   # f32 scalar from SMEM
    z = z_ref[...]                                  # (bb, zx_dim), true width

    # Fused first-layer row: t * W1_time + b1, computed once per tile (sublane broadcast).
    row = t * w1t_ref[...].astype(jnp.float32) + b1_ref[...].astype(jnp.float32)

    h = jnp.dot(z, w1z_ref[...], preferred_element_type=jnp.float32) + row
    h = _gelu(h, approximate_gelu)

    out = jnp.dot(h, w2_ref[...], preferred_element_type=jnp.float32)
    out = out + b2_ref[...].astype(jnp.float32)
    o_ref[...] = out.astype(o_ref.dtype)


def _mlp_kernel_vector_t(t_ref, z_ref, w1t_ref, w1z_ref, b1_ref, w2_ref, b2_ref,
                         o_ref, *, approximate_gelu):
    """Vector-t path: per-row times arrive as a (bb, 1) VMEM column."""
    t = t_ref[...].astype(jnp.float32)              # (bb, 1)
    z = z_ref[...]

    h = jnp.dot(z, w1z_ref[...], preferred_element_type=jnp.float32)
    h = h + t * w1t_ref[...].astype(jnp.float32) + b1_ref[...].astype(jnp.float32)
    h = _gelu(h, approximate_gelu)

    out = jnp.dot(h, w2_ref[...], preferred_element_type=jnp.float32)
    out = out + b2_ref[...].astype(jnp.float32)
    o_ref[...] = out.astype(o_ref.dtype)


def prepare_params(w1, b1, w2, b2):
    """Pad parameters ONCE to the kernel layout (only the hidden dim is lane-padded).

    w1: (zx_dim + 1, num_hidden)   input-major; row 0 is the time input row
    b1: (num_hidden,)
    w2: (num_hidden, zx_dim)
    b2: (zx_dim,)
    """
    din, num_hidden = w1.shape
    zx_dim = din - 1
    assert w2.shape == (num_hidden, zx_dim)
    assert b1.shape == (num_hidden,) and b2.shape == (zx_dim,)

    h_pad = _round_up(max(num_hidden, 1), _LANE)

    w1t = jnp.zeros((1, h_pad), w1.dtype).at[0, :num_hidden].set(w1[0, :])
    w1z = jnp.zeros((zx_dim, h_pad), w1.dtype).at[:, :num_hidden].set(w1[1:, :])
    b1p = jnp.zeros((1, h_pad), b1.dtype).at[0, :num_hidden].set(b1)
    w2p = jnp.zeros((h_pad, zx_dim), w2.dtype).at[:num_hidden, :].set(w2)
    b2p = jnp.reshape(b2, (1, zx_dim))

    return dict(w1t=w1t, w1z=w1z, b1=b1p, w2=w2p, b2=b2p,
                zx_dim=zx_dim, num_hidden=num_hidden, h_pad=h_pad)


def node_func_wide_time_variant_rna_forward(t, z, params, *, block_b=None,
                                            approximate_gelu=False):
    """Pallas implementation of node_func_wide_time_variant_rna.forward(t, z).

    t: scalar (typical ODE-solver case, goes through SMEM) or (B,) / (B, 1) array
    z: (B, zx_dim)
    params: output of prepare_params (hidden dim of weights pre-padded to a lane multiple).
    """
    zx_dim = params["zx_dim"]
    num_hidden = params["num_hidden"]
    h_pad = params["h_pad"]

    B = z.shape[0]
    assert z.shape[1] == zx_dim

    # Batch tile: big enough to amortize the ~0.35us/step grid overhead, guaranteed >= 2
    # grid steps for B > 512 so the "parallel" axis megacore-shards on v7x, and capped at
    # 2048 rows (double-buffered 2048 x zx_dim f32 tiles stay well inside scoped VMEM).
    if block_b is None:
        if B <= 512:
            block_b = B
        else:
            block_b = min(2048, _round_up(-(-B // 2), 8))
    block_b = min(block_b, B)
    grid = (pl.cdiv(B, block_b),)

    # Advisory cost estimate, using the true (unpadded) math sizes.
    itemsize = jnp.dtype(z.dtype).itemsize
    flops = 2 * B * (zx_dim + 1) * num_hidden + 2 * B * num_hidden * zx_dim
    weight_bytes = (((zx_dim + 1) * num_hidden + num_hidden
                     + num_hidden * zx_dim + zx_dim)
                    * jnp.dtype(params["w1z"].dtype).itemsize)
    bytes_accessed = 2 * B * zx_dim * itemsize + weight_bytes + 4
    cost = pl.CostEstimate(flops=int(flops),
                           transcendentals=int(B * num_hidden),
                           bytes_accessed=int(bytes_accessed))

    cparams = pltpu.CompilerParams(
        dimension_semantics=("parallel",),
        vmem_limit_bytes=32 * 1024 * 1024,   # safe on v5e/v6e/v7x; tiles here are tiny
    )

    # Shared specs. Weight blocks are constant-index and VMEM-resident; their minor dims
    # are either a multiple of 128 (h_pad) or equal to the full array dim (zx_dim) -> legal.
    # The *_ absorbs the scalar-prefetch ref when it is present.
    weight_specs = [
        pl.BlockSpec((1, h_pad), lambda i, *_: (0, 0)),        # W1 time row
        pl.BlockSpec((zx_dim, h_pad), lambda i, *_: (0, 0)),   # W1 latent rows
        pl.BlockSpec((1, h_pad), lambda i, *_: (0, 0)),        # b1
        pl.BlockSpec((h_pad, zx_dim), lambda i, *_: (0, 0)),   # W2
        pl.BlockSpec((1, zx_dim), lambda i, *_: (0, 0)),       # b2
    ]
    z_spec = pl.BlockSpec((block_b, zx_dim), lambda i, *_: (i, 0))
    out_spec = pl.BlockSpec((block_b, zx_dim), lambda i, *_: (i, 0))
    out_shape = jax.ShapeDtypeStruct((B, zx_dim), z.dtype)

    t_arr = jnp.asarray(t, dtype=jnp.float32)

    if t_arr.ndim == 0:
        # Scalar ODE time: pass through SMEM via scalar prefetch (no HBM column).
        kernel = functools.partial(_mlp_kernel_scalar_t,
                                   approximate_gelu=approximate_gelu)
        grid_spec = pltpu.PrefetchScalarGridSpec(
            num_scalar_prefetch=1,
            grid=grid,
            in_specs=[z_spec] + weight_specs,
            out_specs=out_spec,
        )
        return pl.pallas_call(
            kernel, out_shape=out_shape, grid_spec=grid_spec,
            compiler_params=cparams, cost_estimate=cost,
        )(t_arr.reshape(1), z, params["w1t"], params["w1z"], params["b1"],
          params["w2"], params["b2"])

    # Vector t: per-row times as a (B, 1) column streamed alongside z.
    t_col = t_arr.reshape(B, 1)
    kernel = functools.partial(_mlp_kernel_vector_t,
                               approximate_gelu=approximate_gelu)
    grid_spec = pltpu.PrefetchScalarGridSpec(
        num_scalar_prefetch=0,
        grid=grid,
        in_specs=[pl.BlockSpec((block_b, 1), lambda i: (i, 0)), z_spec] + weight_specs,
        out_specs=out_spec,
    )
    return pl.pallas_call(
        kernel, out_shape=out_shape, grid_spec=grid_spec,
        compiler_params=cparams, cost_estimate=cost,
    )(t_col, z, params["w1t"], params["w1z"], params["b1"],
      params["w2"], params["b2"])


def init_params(key, zx_dim, num_hidden):
    """Deterministic small-scale init, input-major layout (row 0 of W1 = time input)."""
    k1, k2 = jax.random.split(key)
    w1 = 0.02 * jax.random.normal(k1, (zx_dim + 1, num_hidden), dtype=jnp.float32)
    b1 = jnp.zeros((num_hidden,), dtype=jnp.float32)
    w2 = 0.02 * jax.random.normal(k2, (num_hidden, zx_dim), dtype=jnp.float32)
    b2 = jnp.zeros((zx_dim,), dtype=jnp.float32)
    return w1, b1, w2, b2


def _reference_forward(t, z, w1, b1, w2, b2):
    """Pure-JAX reference matching the PyTorch forward."""
    B = z.shape[0]
    t = jnp.asarray(t, dtype=z.dtype)
    t_col = jnp.full((B, 1), t, dtype=z.dtype) if t.ndim == 0 else t.reshape(B, 1)
    x = jnp.concatenate([t_col, z], axis=-1)
    h = x @ w1 + b1
    h = 0.5 * h * (1.0 + jax.lax.erf(h / jnp.sqrt(2.0)))
    return h @ w2 + b2


if __name__ == "__main__":
    # Small shapes consistent with the module: a batch of cells in the RNA latent space.
    batch = 8
    zx_dim = 16
    num_hidden = 32

    key = jax.random.PRNGKey(0)
    kz, kp = jax.random.split(key)

    z = jax.random.normal(kz, (batch, zx_dim), dtype=jnp.float32)
    t = jnp.float32(0.37)  # scalar ODE time (the common integrator case)

    w1, b1, w2, b2 = init_params(kp, zx_dim, num_hidden)
    params = prepare_params(w1, b1, w2, b2)   # one-time hidden-dim padding

    out = node_func_wide_time_variant_rna_forward(t, z, params)
    out = jax.block_until_ready(out)

    ref = _reference_forward(t, z, w1, b1, w2, b2)
    assert out.shape == (batch, zx_dim)
    assert jnp.allclose(out, ref, atol=1e-5, rtol=1e-5), float(jnp.max(jnp.abs(out - ref)))

    # Also exercise the vector-t path (per-row times passed directly as a column).
    t_vec = jnp.linspace(0.0, 1.0, batch, dtype=jnp.float32).reshape(batch, 1)
    out_v = jax.block_until_ready(
        node_func_wide_time_variant_rna_forward(t_vec, z, params))
    ref_v = _reference_forward(t_vec, z, w1, b1, w2, b2)
    assert jnp.allclose(out_v, ref_v, atol=1e-5, rtol=1e-5), \
        float(jnp.max(jnp.abs(out_v - ref_v)))

    print("KERNEL_OK")
</pallas_src>

<mosaic_0001>
module attributes {stable_mosaic.version = 11 : i64} {
  func.func @_mlp_kernel_scalar_t(%arg0: i32, %arg1: memref<1xf32, #tpu.memory_space<smem>>, %arg2: memref<8x16xf32, #tpu.memory_space<vmem>>, %arg3: memref<1x128xf32, #tpu.memory_space<vmem>>, %arg4: memref<16x128xf32, #tpu.memory_space<vmem>>, %arg5: memref<1x128xf32, #tpu.memory_space<vmem>>, %arg6: memref<128x16xf32, #tpu.memory_space<vmem>>, %arg7: memref<1x16xf32, #tpu.memory_space<vmem>>, %arg8: memref<8x16xf32, #tpu.memory_space<vmem>>) attributes {dimension_semantics = [#tpu.dimension_semantics<parallel>], iteration_bounds = array<i64: 1>, scalar_prefetch = 1 : i64, scratch_operands = 0 : i64, tpu.core_type = #tpu.core_type<tc>, window_params = [{transform_indices = @transform_0, window_bounds = array<i64: 8, 16>}, {pipeline_mode = #tpu.pipeline_mode<synchronous>, transform_indices = @transform_1, window_bounds = array<i64: 1, 128>}, {pipeline_mode = #tpu.pipeline_mode<synchronous>, transform_indices = @transform_2, window_bounds = array<i64: 16, 128>}, {pipeline_mode = #tpu.pipeline_mode<synchronous>, transform_indices = @transform_3, window_bounds = array<i64: 1, 128>}, {pipeline_mode = #tpu.pipeline_mode<synchronous>, transform_indices = @transform_4, window_bounds = array<i64: 128, 16>}, {pipeline_mode = #tpu.pipeline_mode<synchronous>, transform_indices = @transform_5, window_bounds = array<i64: 1, 16>}, {transform_indices = @transform_6, window_bounds = array<i64: 8, 16>}]} {
    %c0 = arith.constant 0 : index
    %0 = memref.load %arg1[%c0] : memref<1xf32, #tpu.memory_space<smem>>
    %c0_0 = arith.constant 0 : index
    %c0_1 = arith.constant 0 : index
    %1 = vector.load %arg2[%c0_0, %c0_1] : memref<8x16xf32, #tpu.memory_space<vmem>>, vector<8x16xf32>
    %c0_2 = arith.constant 0 : index
    %c0_3 = arith.constant 0 : index
    %2 = vector.load %arg3[%c0_2, %c0_3] : memref<1x128xf32, #tpu.memory_space<vmem>>, vector<1x128xf32>
    %3 = vector.broadcast %0 : f32 to vector<1x128xf32>
    %4 = arith.mulf %3, %2 : vector<1x128xf32>
    %c0_4 = arith.constant 0 : index
    %c0_5 = arith.constant 0 : index
    %5 = vector.load %arg5[%c0_4, %c0_5] : memref<1x128xf32, #tpu.memory_space<vmem>>, vector<1x128xf32>
    %6 = arith.addf %4, %5 : vector<1x128xf32>
    %c0_6 = arith.constant 0 : index
    %c0_7 = arith.constant 0 : index
    %7 = vector.load %arg4[%c0_6, %c0_7] : memref<16x128xf32, #tpu.memory_space<vmem>>, vector<16x128xf32>
    %cst = arith.constant dense<0.000000e+00> : vector<8x128xf32>
    %8 = tpu.matmul %1, %7, %cst {dimension_numbers = #tpu.dot_dimension_numbers<[1], [0], [0], [1], [0, 0, 1, 1], [], []>} : vector<8x16xf32>, vector<16x128xf32>, vector<8x128xf32> -> vector<8x128xf32>
    %9 = vector.broadcast %6 : vector<1x128xf32> to vector<8x128xf32>
    %10 = arith.addf %8, %9 : vector<8x128xf32>
    %cst_8 = arith.constant 5.000000e-01 : f32
    %11 = vector.broadcast %cst_8 : f32 to vector<8x128xf32>
    %12 = arith.mulf %11, %10 : vector<8x128xf32>
    %cst_9 = arith.constant 0.707106769 : f32
    %13 = vector.broadcast %cst_9 : f32 to vector<8x128xf32>
    %14 = arith.mulf %10, %13 : vector<8x128xf32>
    %15 = math.erf %14 : vector<8x128xf32>
    %cst_10 = arith.constant 1.000000e+00 : f32
    %16 = vector.broadcast %cst_10 : f32 to vector<8x128xf32>
    %17 = arith.addf %16, %15 : vector<8x128xf32>
    %18 = arith.mulf %12, %17 : vector<8x128xf32>
    %c0_11 = arith.constant 0 : index
    %c0_12 = arith.constant 0 : index
    %19 = vector.load %arg6[%c0_11, %c0_12] : memref<128x16xf32, #tpu.memory_space<vmem>>, vector<128x16xf32>
    %cst_13 = arith.constant dense<0.000000e+00> : vector<8x16xf32>
    %20 = tpu.matmul %18, %19, %cst_13 {dimension_numbers = #tpu.dot_dimension_numbers<[1], [0], [0], [1], [0, 0, 1, 1], [], []>} : vector<8x128xf32>, vector<128x16xf32>, vector<8x16xf32> -> vector<8x16xf32>
    %c0_14 = arith.constant 0 : index
    %c0_15 = arith.constant 0 : index
    %21 = vector.load %arg7[%c0_14, %c0_15] : memref<1x16xf32, #tpu.memory_space<vmem>>, vector<1x16xf32>
    %22 = vector.broadcast %21 : vector<1x16xf32> to vector<8x16xf32>
    %23 = arith.addf %20, %22 : vector<8x16xf32>
    %c0_16 = arith.constant 0 : index
    %c0_17 = arith.constant 0 : index
    %24 = vector.load %arg8[%c0_16, %c0_17] : memref<8x16xf32, #tpu.memory_space<vmem>>, vector<8x16xf32>
    tpu.vector_store %arg8[%c0_16, %c0_17], %23 {strides = array<i32>} : memref<8x16xf32, #tpu.memory_space<vmem>>, vector<8x16xf32>,
    return
  }
  func.func @transform_0(%arg0: i32, %arg1: memref<1xf32, #tpu.memory_space<smem>>) -> (i32, i32) {
    %c0_i32 = arith.constant 0 : i32
    %c0_i32_0 = arith.constant 0 : i32
    return %arg0, %c0_i32 : i32, i32
  }
  func.func @transform_1(%arg0: i32, %arg1: memref<1xf32, #tpu.memory_space<smem>>) -> (i32, i32) {
    %c0_i32 = arith.constant 0 : i32
    %c0_i32_0 = arith.constant 0 : i32
    %c0_i32_1 = arith.constant 0 : i32
    return %c0_i32, %c0_i32_0 : i32, i32
  }
  func.func @transform_2(%arg0: i32, %arg1: memref<1xf32, #tpu.memory_space<smem>>) -> (i32, i32) {
    %c0_i32 = arith.constant 0 : i32
    %c0_i32_0 = arith.constant 0 : i32
    %c0_i32_1 = arith.constant 0 : i32
    return %c0_i32, %c0_i32_0 : i32, i32
  }
  func.func @transform_3(%arg0: i32, %arg1: memref<1xf32, #tpu.memory_space<smem>>) -> (i32, i32) {
    %c0_i32 = arith.constant 0 : i32
    %c0_i32_0 = arith.constant 0 : i32
    %c0_i32_1 = arith.constant 0 : i32
    return %c0_i32, %c0_i32_0 : i32, i32
  }
  func.func @transform_4(%arg0: i32, %arg1: memref<1xf32, #tpu.memory_space<smem>>) -> (i32, i32) {
    %c0_i32 = arith.constant 0 : i32
    %c0_i32_0 = arith.constant 0 : i32
    %c0_i32_1 = arith.constant 0 : i32
    return %c0_i32, %c0_i32_0 : i32, i32
  }
  func.func @transform_5(%arg0: i32, %arg1: memref<1xf32, #tpu.memory_space<smem>>) -> (i32, i32) {
    %c0_i32 = arith.constant 0 : i32
    %c0_i32_0 = arith.constant 0 : i32
    %c0_i32_1 = arith.constant 0 : i32
    return %c0_i32, %c0_i32_0 : i32, i32
  }
  func.func @transform_6(%arg0: i32, %arg1: memref<1xf32, #tpu.memory_space<smem>>) -> (i32, i32) {
    %c0_i32 = arith.constant 0 : i32
    %c0_i32_0 = arith.constant 0 : i32
    return %arg0, %c0_i32 : i32, i32
  }
}

</mosaic_0001>

<bundles_post_ra>
// kernel: tpu_custom_call.1
= control target key start
LH: loop header
LB: loop body
LE: loop exit
PB: predicated region body
PF: predicated region fallthrough
CT: control target
= control target key end

     0   :  { %v319_v1 = vmov 0.0   ;;  %vm320_vm0 = vmmov 0   ;;  %vm41_vm1 = vcmask 130048   ;;  %s438_s0 = inlined_call_operand.<no memory space> [shape: f32[1], index: 0, kind: input, shape index: {}]   ;;  %s439_s1 = inlined_call_operand.vmem [shape: f32[8,16], index: 1, kind: input, shape index: {}]   ;;  %s440_s2 = inlined_call_operand.vmem [shape: f32[1,128], index: 2, kind: input, shape index: {}]   ;;  %s441_s3 = inlined_call_operand.vmem [shape: f32[16,128], index: 3, kind: input, shape index: {}]   ;;  %s442_s4 = inlined_call_operand.vmem [shape: f32[1,128], index: 4, kind: input, shape index: {}]   ;;  %s443_s5 = inlined_call_operand.vmem [shape: f32[128,16], index: 5, kind: input, shape index: {}]   ;;  %s444_s6 = inlined_call_operand.vmem [shape: f32[1,16], index: 6, kind: input, shape index: {}]   ;;  %s445_s7 = inlined_call_operand.hbm [shape: f32[8,16], index: 7, kind: output, shape index: {}]  }
   0x1   :  { %v34_v0 = vld [vmem:[%s441_s3 + $0x8] sm:$0xff]  ;;  %250 = vmatprep.subr.mxu0 %v319_v1  ;;  %v33_v2 = vld [vmem:[%s441_s3] sm:$0xff]  ;;  %254 = vmatprep.mubr.msk.f32.mxu0 %vm320_vm0, %v319_v1  ;;  %v135_v3 = vld [vmem:[%s443_s5 + $0x78] sm:$0xff] }
   0x2   :  { %251 = vmatpush3.msra.mxu0 %v34_v0  ;;  %v27_v4 = vld [vmem:[%s439_s1] sm:$0xff]  ;;  %257 = vmatprep.subr.mxu1 %v319_v1  ;;  %v134_v5 = vld [vmem:[%s443_s5 + $0x70] sm:$0xff] }
   0x3   :  { %252 = vmatprep.subr.mxu0 %v319_v1  ;;  %258 = vmatpush3.msra.mxu1 %v135_v3 }
   0x4   :  { %13 = vsyncpa [#allocation5], 0  ;;  %253 = vmatpush3.msra.mxu0 %v33_v2  ;;  %259 = vmatprep.subr.mxu1 %v319_v1  ;;  %v133_v6 = vld [vmem:[%s443_s5 + $0x68] sm:$0xff]  ;;  %v132_v7 = vld [vmem:[%s443_s5 + $0x60] sm:$0xff]  ;;  %v36_v20 = vlaneseq  ;;  %v29_v22 = vstv %s438_s0 }
   0x5   :  { %255 = vmatmul.mubr.msk.f32.vlgmr.msra.gmra.mxu0 %vm41_vm1, %v27_v4  ;;  %260 = vmatpush3.msra.mxu1 %v134_v5  ;;  %v131_v8 = vld [vmem:[%s443_s5 + $0x58] sm:$0xff]  ;;  %v130_v9 = vld [vmem:[%s443_s5 + $0x50] sm:$0xff]  ;;  %v129_v10 = vld [vmem:[%s443_s5 + $0x48] sm:$0xff] }
   0x6   :  { %261 = vmatprep.subr.mxu1 %v319_v1  ;;  %289 = vmatprep.mubr.msk.f32.mxu1 %vm320_vm0, %v319_v1  ;;  %v128_v11 = vld [vmem:[%s443_s5 + $0x40] sm:$0xff]  ;;  %v127_v12 = vld [vmem:[%s443_s5 + $0x38] sm:$0xff]  ;;  %v126_v13 = vld [vmem:[%s443_s5 + $0x30] sm:$0xff]  ;;  %v37_v24 = vshrl.u32 %v36_v20, 7 }
   0x7   :  { %262 = vmatpush3.msra.mxu1 %v133_v6  ;;  %v125_v14 = vld [vmem:[%s443_s5 + $0x28] sm:$0xff]  ;;  %v124_v15 = vld [vmem:[%s443_s5 + $0x20] sm:$0xff]  ;;  %v123_v16 = vld [vmem:[%s443_s5 + $0x18] sm:$0xff] }
   0x8   :  { %263 = vmatprep.subr.mxu1 %v319_v1  ;;  %v122_v17 = vld [vmem:[%s443_s5 + $0x10] sm:$0xff]  ;;  %v121_v18 = vld [vmem:[%s443_s5 + $0x8] sm:$0xff]  ;;  %v120_v19 = vld [vmem:[%s443_s5] sm:$0xff]  ;;  %v38_v27 = vsub.s32 0, %v37_v24  ;;  %s321_s5 = smov [#allocation4]  }
   0x9   :  { %264 = vmatpush3.msra.mxu1 %v132_v7  ;;  %v28_v21 = vld [vmem:[%s440_s2] sm:$0x1]  ;;  %s220_s18 = sshll.u32 %s321_s5, 4  ;;  %s221_s18 = int_to_ptr.vmem [resolvable:$true] %s220_s18 }
   0xa   :  { %265 = vmatprep.subr.mxu1 %v319_v1  ;;  %v30_v23 = vmul.f32 %v29_v22, %v28_v21  ;;  %v31_v25 = vld [vmem:[%s442_s4] sm:$0x1]  ;;  %s297_s4 = scalar_lea.vmem %s221_s18, 128  ;;  %p302_p1 = scmp.lt.s32.totalorder %s221_s18, %s221_s18 }
   0xb   :  { %266 = vmatpush3.msra.mxu1 %v131_v8  ;;  %v229_v37 = vld [vmem:[%s444_s6] ss:$0 sm:$0xff]  ;;  %p298_p0 = scmp.ne.s32.totalorder %s221_s18, %s297_s4  ;;  %p303_p2 = scmp.lt.s32.totalorder %s297_s4, %s297_s4 }
   0xc   :  { %267 = vmatprep.subr.mxu1 %v319_v1  ;;  %v32_v26 = vadd.f32 %v31_v25, %v30_v23 }
   0xd   :  { %268 = vmatpush3.msra.mxu1 %v130_v9  ;;  %p304_p3 = por %p303_p2, %p302_p1 }
   0xe   :  { %269 = vmatprep.subr.mxu1 %v319_v1  ;;  %v39_v28 = vrot.slane %v32_v26, %v38_v27 }
   0xf   :  { %270 = vmatpush3.msra.mxu1 %v129_v10  ;;  %p305_p4 = pnand %p304_p3, %p298_p0 }
  0x10   :  { %271 = vmatprep.subr.mxu1 %v319_v1 }
  0x11   :  { %272 = vmatpush3.msra.mxu1 %v128_v11 }
  0x12   :  { %273 = vmatprep.subr.mxu1 %v319_v1 }
  0x13   :  { %274 = vmatpush3.msra.mxu1 %v127_v12 }
  0x14   :  { %275 = vmatprep.subr.mxu1 %v319_v1 }
  0x15   :  { %276 = vmatpush3.msra.mxu1 %v126_v13 }
  0x16   :  { %277 = vmatprep.subr.mxu1 %v319_v1 }
  0x17   :  { %278 = vmatpush3.msra.mxu1 %v125_v14 }
  0x18   :  { %279 = vmatprep.subr.mxu1 %v319_v1 }
  0x19   :  { %280 = vmatpush3.msra.mxu1 %v124_v15 }
  0x1a   :  { %281 = vmatprep.subr.mxu1 %v319_v1 }
  0x1b   :  { %282 = vmatpush3.msra.mxu1 %v123_v16 }
  0x1c   :  { %283 = vmatprep.subr.mxu1 %v319_v1 }
  0x1d   :  { %284 = vmatpush3.msra.mxu1 %v122_v17 }
  0x1e   :  { %285 = vmatprep.subr.mxu1 %v319_v1 }
  0x1f   :  { %286 = vmatpush3.msra.mxu1 %v121_v18 }
  0x20   :  { %287 = vmatprep.subr.mxu1 %v319_v1 }
  0x21   :  { %288 = vmatpush3.msra.mxu1 %v120_v19 }
  0xc5   :  { %v111_v29 = vpop.f32.mrf.mxu0 }
  0xc6   :  { %v112_v30 = vadd.f32 %v111_v29, %v39_v28 }
  0xc7   :  { %v256_v31 = vpop.f32.mrf.mxu0 }
  0xc8   :  { %v116_v32 = vmul.f32 0.70710677, %v112_v30  ;;  %v115_v34 = vmul.f32 0.5, %v112_v30 }
  0xca   :  { %295 = verf.f32 %v116_v32 }
  0xd7   :  { %v296_v33 = vpop.eup %295 }
  0xd8   :  { %v118_v35 = vadd.f32 1.0, %v296_v33 }
  0xda   :  { %v119_v36 = vmul.f32 %v118_v35, %v115_v34 }
  0xdc   :  { %290 = vmatmul.mubr.f32.vlgmr.msra.gmra.mxu1 %v119_v36 }
 0x19c   :  { %v209_v38 = vpop.f32.mrf.mxu1 }
 0x19d   :  { %v210_v39 = vadd.f32 %v229_v37, %v209_v38 }
 0x19e   :  { %v291_v40 = vpop.f32.mrf.mxu1 }
 0x19f   :  { %213 = vst.msk [vmem:[#allocation4] sm:$0xff] %vm41_vm1, %v210_v39 }
 0x1a0   :  { %308 = shalt.err (!%p305_p4)
}
 0x1a1   :  { %223 = dma.vmem_to_hbm [thread:$0]  %s221_s18, 128, %s445_s7, [#allocation5]  }
 0x1a2   :  { %317 = dma.done.wait [#allocation5], 128  }
 0x1a3   :  { %318 = vsyncadd [#allocation5], 4294967168 }
 0x1a4   :  { %227 = vsyncpa [#allocation5], 1 }

</bundles_post_ra>
